<compile_context>
chip_gen: v7x
topology: tpu7x:2x2x1
jax: 0.10.0
libtpu: 0.0.40
codegen_flags: <defaults>
</compile_context>

<pallas_src>
import functools

import jax
import jax.numpy as jnp
from jax import lax
from jax.experimental import pallas as pl
from jax.experimental.pallas import tpu as pltpu

VMEM_LIMIT = 48 * 1024 * 1024      # safe explicit scoped-VMEM cap on v5e/v6e/v7x
_NEG_INF = -1e9


# ----------------------------- row-tiled dense (Linear) kernel -----------------------------
def _dense_kernel(x_ref, w_ref, b_ref, o_ref):
    o_ref[...] = (jnp.dot(x_ref[...], w_ref[...], preferred_element_type=jnp.float32)
                  + b_ref[...]).astype(o_ref.dtype)


def dense(x, w, b, *, out_dtype=None, max_tile_m=2048):
    """x: (N, d_in) @ w: (d_in, d_out) + b -> (N, d_out), row-tiled over N.

    The row tile is sized against the VMEM budget (double-buffered x/out blocks plus
    the resident weight), so arbitrarily large N (e.g. the B*T*T rows of the relative
    projection) streams through with large, overhead-amortizing tiles.
    """
    N, d_in = x.shape
    d_out = w.shape[-1]
    out_dtype = jnp.dtype(out_dtype or x.dtype)

    resident = d_in * d_out * w.dtype.itemsize + d_out * 4
    per_row = 2 * (d_in * x.dtype.itemsize + d_out * out_dtype.itemsize)
    cap = max(8, ((VMEM_LIMIT - resident) // max(per_row, 1)) // 8 * 8)
    tm = min(max_tile_m, cap)

    if N <= tm:
        tm, n_rows, xp = N, N, x
    else:
        n_rows = -(-N // tm) * tm
        xp = (jnp.concatenate([x, jnp.zeros((n_rows - N, d_in), x.dtype)], axis=0)
              if n_rows != N else x)

    out = pl.pallas_call(
        _dense_kernel,
        out_shape=jax.ShapeDtypeStruct((n_rows, d_out), out_dtype),
        grid=(n_rows // tm,),
        in_specs=[
            pl.BlockSpec((tm, d_in), lambda m: (m, 0)),
            pl.BlockSpec((d_in, d_out), lambda m: (0, 0)),
            pl.BlockSpec((1, d_out), lambda m: (0, 0)),
        ],
        out_specs=pl.BlockSpec((tm, d_out), lambda m: (m, 0)),
        compiler_params=pltpu.CompilerParams(
            dimension_semantics=("parallel",),
            vmem_limit_bytes=VMEM_LIMIT),
    )(xp, w, b.reshape(1, d_out))
    return out[:N] if n_rows != N else out


# ----------------------------- tile selection -----------------------------
def _pick_tile(n, max_tile, mult):
    """Largest divisor of n that is a multiple of `mult` and <= max_tile, else n
    (a block equal to the full dim is always layout-legal)."""
    if n <= max_tile:
        return n
    t = (max_tile // mult) * mult
    while t >= mult:
        if n % t == 0:
            return t
        t -= mult
    # TODO(synk): pad awkward sequence lengths to a multiple of 128 instead of
    # falling back to a full-axis block here.
    return n


# ----------------------------- absolute-head attention kernel -----------------------------
def _abs_attn_kernel(q_ref, k_ref, v_ref, pqk_q_ref, pqk_k_ref, mb_ref, o_ref,
                     *, scale, d_k):
    """One (batch, abs head, q-tile): content + absolute-position attention. No R."""
    f32, bf16 = jnp.float32, jnp.bfloat16
    # Pq / Pk are split in-kernel from the resident fused (.., 2*d_k) VMEM block.
    q = ((q_ref[0, 0] + pqk_q_ref[0, :, :d_k]).astype(f32) * scale).astype(bf16)  # (tq,d_k)
    k = (k_ref[0, 0] + pqk_k_ref[0, :, d_k:]).astype(bf16)                        # (T, d_k)

    # bf16 MXU operands, fp32 accumulation; scale folded into q; additive bf16 mask bias.
    s = lax.dot_general(q, k, (((1,), (1,)), ((), ())),
                        preferred_element_type=f32)                               # (tq, T)
    s = s + mb_ref[0, 0].astype(f32)
    m = jnp.max(s, axis=-1, keepdims=True)
    e = jnp.exp(s - m)
    p = e * pl.reciprocal(jnp.sum(e, axis=-1, keepdims=True), approx=True)
    # TODO(synk): nn.Dropout on p_attn is identity (eval mode); no in-kernel RNG dropout.
    o_ref[0] = jnp.dot(p.astype(bf16), v_ref[0, 0].astype(bf16),
                       preferred_element_type=f32).astype(o_ref.dtype)


# ----------------------------- relative-head attention kernel -----------------------------
def _rel_attn_kernel(q_ref, k_ref, v_ref, r_ref, bias_ref, mb_ref, o_ref,
                     m_sc, l_sc, acc_sc, *, scale):
    """One (batch, rel head, q-tile), flash-style over the key axis: the (tq, tkv, d_k)
    bf16 R block is the dominant HBM stream and stays VMEM-bounded on every TPU gen."""
    f32, bf16 = jnp.float32, jnp.bfloat16
    j = pl.program_id(2)

    @pl.when(j == 0)
    def _():
        m_sc[...] = jnp.full(m_sc.shape, -jnp.inf, m_sc.dtype)
        l_sc[...] = jnp.zeros(l_sc.shape, l_sc.dtype)
        acc_sc[...] = jnp.zeros(acc_sc.shape, acc_sc.dtype)

    q = q_ref[0, 0].astype(f32) * scale                       # (tq, d_k), scale pre-folded
    k = k_ref[0, 0].astype(bf16)                               # (tkv, d_k)
    v = v_ref[0, 0].astype(bf16)                               # (tkv, d_k)
    r = r_ref[0]                                               # (tq, tkv, d_k) bf16 stream

    # content scores: bf16 MXU operands, fp32 accumulation.
    s = lax.dot_general(q.astype(bf16), k, (((1,), (1,)), ((), ())),
                        preferred_element_type=f32)            # (tq, tkv)
    # relative-position scores on the VPU/XLU: broadcast-multiply + reduce over d_k.
    # Temporary bounded to (tq, tkv, d_k); no degenerate M=1 MXU pushes.
    qb = q + bias_ref[...].astype(f32) * scale                 # (tq, d_k)
    s = s + jnp.sum(qb[:, None, :] * r, axis=-1)               # (tq, tkv)
    s = s + mb_ref[0, 0].astype(f32)                           # additive bf16 mask bias

    # online softmax accumulation over key tiles
    m_new = jnp.maximum(m_sc[...], jnp.max(s, axis=-1, keepdims=True))
    alpha = jnp.exp(m_sc[...] - m_new)
    p = jnp.exp(s - m_new)
    l_sc[...] = alpha * l_sc[...] + jnp.sum(p, axis=-1, keepdims=True)
    acc_sc[...] = alpha * acc_sc[...] + jnp.dot(p.astype(bf16), v,
                                                preferred_element_type=f32)
    m_sc[...] = m_new

    @pl.when(j == pl.num_programs(2) - 1)
    def _():
        # TODO(synk): the info['attn_layer'] attention-prob side output is not returned.
        o_ref[0] = (acc_sc[...]
                    * pl.reciprocal(l_sc[...], approx=True)).astype(o_ref.dtype)


# ----------------------------- forward wrapper -----------------------------
def mixed_attention_forward(params, query, key, value, mask, abs_kernel, rel_kernel,
                            *, r_dtype=jnp.bfloat16, max_tq=128, max_tkv=256):
    B, T, d_model = query.shape
    La, Lr = params['La'], params['Lr']
    h = La + Lr
    d_k = d_model // h
    scale = 1.0 / (d_k ** 0.5)
    dt = query.dtype

    # ---- content projections -> q, k, v: (B, h, T, d_k) ----
    if (query is key) and (key is value):
        # self-attention fast path: one fused (d_model, 3*d_model) GEMM, single activation read.
        w_qkv = jnp.concatenate([wb[0] for wb in params['content']], axis=1)
        b_qkv = jnp.concatenate([wb[1] for wb in params['content']], axis=0)
        qkv = dense(query.reshape(B * T, d_model), w_qkv, b_qkv)
        qkv = qkv.reshape(B, T, 3, h, d_k).transpose(2, 0, 3, 1, 4)
        q, k, v = qkv[0], qkv[1], qkv[2]
    else:
        def proj(x, wb):
            y = dense(x.reshape(B * T, d_model), *wb)
            return y.reshape(B, T, h, d_k).transpose(0, 2, 1, 3)
        q = proj(query, params['content'][0])
        k = proj(key, params['content'][1])
        v = proj(value, params['content'][2])

    # compact additive mask bias shared across heads, stored bf16: (B, 1, T, T)
    mask_bias = jnp.where(mask == 0, _NEG_INF, 0.0).astype(jnp.bfloat16)

    # tiles: divisors of T (full axis when T is small); mask/score lane dim needs 128.
    tq = _pick_tile(T, max_tq, 8)
    tkv = _pick_tile(T, max_tkv, 128)
    if tkv == T and T > max_tkv:
        # no multiple-of-128 divisor: shrink the query tile instead so the bf16
        # (tq, tkv, d_k) R block stays well inside the per-call VMEM budget.
        r_budget = 8 * 1024 * 1024
        tq = _pick_tile(T, max(8, (r_budget // (tkv * d_k * 2)) // 8 * 8), 8)

    head_outs = []

    # ---- absolute heads (heads [0, La)) ----
    for l in range(La):
        # fuse Pq/Pk projections of abs_kernel[l] into one GEMM (single read of the
        # abs kernel activation, lane-denser 2*d_k output); split in-kernel.
        w_pqk = jnp.concatenate([params['abs_q'][l][0], params['abs_k'][l][0]], axis=1)
        b_pqk = jnp.concatenate([params['abs_q'][l][1], params['abs_k'][l][1]], axis=0)
        pqk = dense(abs_kernel[l].reshape(B * T, d_model), w_pqk, b_pqk)
        pqk = pqk.reshape(B, T, 2 * d_k)

        kern = functools.partial(_abs_attn_kernel, scale=scale, d_k=d_k)
        o = pl.pallas_call(
            kern,
            out_shape=jax.ShapeDtypeStruct((B, T, d_k), dt),
            grid=(B, T // tq),
            in_specs=[
                pl.BlockSpec((1, 1, tq, d_k), lambda b, i, hh=l: (b, hh, i, 0)),   # q
                pl.BlockSpec((1, 1, T, d_k), lambda b, i, hh=l: (b, hh, 0, 0)),    # k
                pl.BlockSpec((1, 1, T, d_k), lambda b, i, hh=l: (b, hh, 0, 0)),    # v
                pl.BlockSpec((1, tq, 2 * d_k), lambda b, i: (b, i, 0)),            # Pq|Pk (q rows)
                pl.BlockSpec((1, T, 2 * d_k), lambda b, i: (b, 0, 0)),             # Pq|Pk (k rows)
                pl.BlockSpec((1, 1, tq, T), lambda b, i: (b, 0, i, 0)),            # mask bias
            ],
            out_specs=pl.BlockSpec((1, tq, d_k), lambda b, i: (b, i, 0)),
            compiler_params=pltpu.CompilerParams(
                dimension_semantics=("parallel", "parallel"),
                vmem_limit_bytes=VMEM_LIMIT),
        )(q, k, v, pqk, pqk, mask_bias)
        head_outs.append(o)

    # ---- relative heads (heads [La, h)) ----
    for l in range(Lr):
        # project rel_kernel[l] directly (no (Lr, B*T*T, d_model) stack copy);
        # stream R in bf16 to halve the dominant HBM traffic.
        # TODO(synk): emit R in a (.., d_k, tkv) layout for lane-dense stores and a
        # sublane reduction when d_k < 128.
        r = dense(rel_kernel[l].reshape(B * T * T, d_model), *params['rel_k'][l],
                  out_dtype=r_dtype).reshape(B, T, T, d_k)
        rel_bias = params['rel_position_bias'][0, l].reshape(1, d_k)

        kern = functools.partial(_rel_attn_kernel, scale=scale)
        o = pl.pallas_call(
            kern,
            out_shape=jax.ShapeDtypeStruct((B, T, d_k), dt),
            grid=(B, T // tq, T // tkv),
            in_specs=[
                pl.BlockSpec((1, 1, tq, d_k), lambda b, i, j, hh=La + l: (b, hh, i, 0)),   # q
                pl.BlockSpec((1, 1, tkv, d_k), lambda b, i, j, hh=La + l: (b, hh, j, 0)),  # k
                pl.BlockSpec((1, 1, tkv, d_k), lambda b, i, j, hh=La + l: (b, hh, j, 0)),  # v
                pl.BlockSpec((1, tq, tkv, d_k), lambda b, i, j: (b, i, j, 0)),             # R
                pl.BlockSpec((1, d_k), lambda b, i, j: (0, 0)),                            # rel bias
                pl.BlockSpec((1, 1, tq, tkv), lambda b, i, j: (b, 0, i, j)),               # mask bias
            ],
            out_specs=pl.BlockSpec((1, tq, d_k), lambda b, i, j: (b, i, 0)),
            scratch_shapes=[
                pltpu.VMEM((tq, 1), jnp.float32),      # running max
                pltpu.VMEM((tq, 1), jnp.float32),      # running sum
                pltpu.VMEM((tq, d_k), jnp.float32),    # fp32 output accumulator
            ],
            compiler_params=pltpu.CompilerParams(
                dimension_semantics=("parallel", "parallel", "arbitrary"),
                vmem_limit_bytes=VMEM_LIMIT),
        )(q, k, v, r, rel_bias, mask_bias)
        head_outs.append(o)

    # per-head outputs assemble along the feature axis directly into the (B, T, h*d_k)
    # layout the output projection consumes (no (B, h, T, d_k) transpose round-trip).
    x = head_outs[0] if len(head_outs) == 1 else jnp.concatenate(head_outs, axis=-1)
    return dense(x.reshape(B * T, h * d_k), *params['output']).reshape(B, T, d_model)


# ----------------------------- deterministic params -----------------------------
def init_params(key, d_model, La, Lr):
    h = La + Lr
    d_k = d_model // h
    keys = jax.random.split(key, 32)
    it = iter(keys)

    def lin(d_in, d_out):
        return (jax.random.normal(next(it), (d_in, d_out), jnp.float32) * 0.05,
                jax.random.normal(next(it), (d_out,), jnp.float32) * 0.05)

    return {
        'La': La, 'Lr': Lr,
        'content': [lin(d_model, d_model) for _ in range(3)],
        'abs_q': [lin(d_model, d_k) for _ in range(La)],
        'abs_k': [lin(d_model, d_k) for _ in range(La)],
        'rel_k': [lin(d_model, d_k) for _ in range(Lr)],
        'rel_position_bias':
            jax.random.normal(next(it), (1, Lr, 1, d_k), jnp.float32) * 0.05,
        'output': lin(d_model, d_model),
    }


# ----------------------------- pure-JAX reference -----------------------------
def reference_forward(params, query, key, value, mask, abs_kernel, rel_kernel):
    B, T, d_model = query.shape
    La, Lr = params['La'], params['Lr']
    h = La + Lr
    d_k = d_model // h
    scale = 1.0 / (d_k ** 0.5)

    def lin(x, wb):
        return x @ wb[0] + wb[1]

    q, k, v = [lin(x, wb).reshape(B, T, h, d_k).transpose(0, 2, 1, 3)
               for wb, x in zip(params['content'], (query, key, value))]
    scores = jnp.zeros((B, h, T, T), jnp.float32)
    if La > 0:
        Xq, Xk = q[:, :La], k[:, :La]
        Pq = jnp.stack([lin(abs_kernel[l], params['abs_q'][l]) for l in range(La)], axis=1)
        Pk = jnp.stack([lin(abs_kernel[l], params['abs_k'][l]) for l in range(La)], axis=1)
        scores = scores.at[:, :La].add(jnp.einsum('blid,bljd->blij', Xq + Pq, Xk + Pk))
    if Lr > 0:
        Xq, Xk = q[:, La:], k[:, La:]
        R = jnp.stack([lin(rel_kernel[l], params['rel_k'][l]) for l in range(Lr)], axis=1)
        rel = jnp.einsum('blid,bljd->blij', Xq, Xk)
        rel = rel + jnp.einsum('blid,blijd->blij', Xq + params['rel_position_bias'], R)
        scores = scores.at[:, La:].add(rel)
    scores = scores * scale
    scores = jnp.where(mask == 0, -1e9, scores)
    p = jax.nn.softmax(scores, axis=-1)
    x = jnp.einsum('bhij,bhjd->bhid', p, v)
    x = x.transpose(0, 2, 1, 3).reshape(B, T, h * d_k)
    return lin(x, params['output'])


if __name__ == "__main__":
    B, T, d_model, La, Lr = 2, 8, 32, 2, 2

    root = jax.random.PRNGKey(0)
    kp, kx, ka, kr = jax.random.split(root, 4)
    params = init_params(kp, d_model, La, Lr)

    # canonical MEANTIME usage is self-attention: query = key = value = hidden states
    x_in = jax.random.normal(kx, (B, T, d_model), jnp.float32)
    abs_kernel = [jax.random.normal(jax.random.fold_in(ka, l), (B, T, d_model), jnp.float32)
                  for l in range(La)]
    rel_kernel = [jax.random.normal(jax.random.fold_in(kr, l), (B, T, T, d_model), jnp.float32)
                  for l in range(Lr)]
    mask = jnp.broadcast_to(jnp.tril(jnp.ones((T, T), jnp.float32))[None, None],
                            (B, 1, T, T))

    out = mixed_attention_forward(params, x_in, x_in, x_in, mask, abs_kernel, rel_kernel)
    out = jax.block_until_ready(out)

    ref = reference_forward(params, x_in, x_in, x_in, mask, abs_kernel, rel_kernel)
    assert out.shape == (B, T, d_model)
    max_err = float(jnp.max(jnp.abs(out - ref)))
    # Attention matmuls run with bf16 MXU operands (fp32 accumulation), R is streamed
    # in bf16 and softmax uses the approximate EUP reciprocal -> relaxed tolerance.
    assert jnp.allclose(out, ref, atol=1e-2, rtol=1e-2), max_err
    print("KERNEL_OK")
</pallas_src>

<mosaic_0001>
module attributes {stable_mosaic.version = 11 : i64} {
  func.func @_dense_kernel(%arg0: i32, %arg1: memref<16x32xf32, #tpu.memory_space<vmem>>, %arg2: memref<32x96xf32, #tpu.memory_space<vmem>>, %arg3: memref<1x96xf32, #tpu.memory_space<vmem>>, %arg4: memref<16x96xf32, #tpu.memory_space<vmem>>) attributes {dimension_semantics = [#tpu.dimension_semantics<parallel>], iteration_bounds = array<i64: 1>, scalar_prefetch = 0 : i64, scratch_operands = 0 : i64, tpu.core_type = #tpu.core_type<tc>, window_params = [{transform_indices = @transform_0, window_bounds = array<i64: 16, 32>}, {pipeline_mode = #tpu.pipeline_mode<synchronous>, transform_indices = @transform_1, window_bounds = array<i64: 32, 96>}, {pipeline_mode = #tpu.pipeline_mode<synchronous>, transform_indices = @transform_2, window_bounds = array<i64: 1, 96>}, {transform_indices = @transform_3, window_bounds = array<i64: 16, 96>}]} {
    %c0 = arith.constant 0 : index
    %c0_0 = arith.constant 0 : index
    %0 = vector.load %arg1[%c0, %c0_0] : memref<16x32xf32, #tpu.memory_space<vmem>>, vector<16x32xf32>
    %c0_1 = arith.constant 0 : index
    %c0_2 = arith.constant 0 : index
    %1 = vector.load %arg2[%c0_1, %c0_2] : memref<32x96xf32, #tpu.memory_space<vmem>>, vector<32x96xf32>
    %cst = arith.constant dense<0.000000e+00> : vector<16x96xf32>
    %2 = tpu.matmul %0, %1, %cst {dimension_numbers = #tpu.dot_dimension_numbers<[1], [0], [0], [1], [0, 0, 1, 1], [], []>} : vector<16x32xf32>, vector<32x96xf32>, vector<16x96xf32> -> vector<16x96xf32>
    %c0_3 = arith.constant 0 : index
    %c0_4 = arith.constant 0 : index
    %3 = vector.load %arg3[%c0_3, %c0_4] : memref<1x96xf32, #tpu.memory_space<vmem>>, vector<1x96xf32>
    %4 = vector.broadcast %3 : vector<1x96xf32> to vector<16x96xf32>
    %5 = arith.addf %2, %4 : vector<16x96xf32>
    %c0_5 = arith.constant 0 : index
    %c0_6 = arith.constant 0 : index
    %6 = vector.load %arg4[%c0_5, %c0_6] : memref<16x96xf32, #tpu.memory_space<vmem>>, vector<16x96xf32>
    tpu.vector_store %arg4[%c0_5, %c0_6], %5 {strides = array<i32>} : memref<16x96xf32, #tpu.memory_space<vmem>>, vector<16x96xf32>,
    return
  }
  func.func @transform_0(%arg0: i32) -> (i32, i32) {
    %c0_i32 = arith.constant 0 : i32
    %c0_i32_0 = arith.constant 0 : i32
    return %arg0, %c0_i32 : i32, i32
  }
  func.func @transform_1(%arg0: i32) -> (i32, i32) {
    %c0_i32 = arith.constant 0 : i32
    %c0_i32_0 = arith.constant 0 : i32
    %c0_i32_1 = arith.constant 0 : i32
    return %c0_i32, %c0_i32_0 : i32, i32
  }
  func.func @transform_2(%arg0: i32) -> (i32, i32) {
    %c0_i32 = arith.constant 0 : i32
    %c0_i32_0 = arith.constant 0 : i32
    %c0_i32_1 = arith.constant 0 : i32
    return %c0_i32, %c0_i32_0 : i32, i32
  }
  func.func @transform_3(%arg0: i32) -> (i32, i32) {
    %c0_i32 = arith.constant 0 : i32
    %c0_i32_0 = arith.constant 0 : i32
    return %arg0, %c0_i32 : i32, i32
  }
}

</mosaic_0001>

<bundles_post_ra>
// kernel: tpu_custom_call.1
= control target key start
LH: loop header
LB: loop body
LE: loop exit
PB: predicated region body
PF: predicated region fallthrough
CT: control target
= control target key end

     0   :  { %8 = vsyncpa [#allocation3], 0  ;;  %s337_s0 = inlined_call_operand.hbm [shape: f32[16,32], index: 0, kind: input, shape index: {}]   ;;  %s338_s1 = inlined_call_operand.hbm [shape: f32[32,96], index: 1, kind: input, shape index: {}]   ;;  %s339_s2 = inlined_call_operand.vmem [shape: f32[1,96], index: 2, kind: input, shape index: {}]   ;;  %s340_s3 = inlined_call_operand.hbm [shape: f32[16,96], index: 3, kind: output, shape index: {}]  }
   0x1   :  { %9 = vsyncpa [#allocation6], 0 }
   0x2   :  { %10 = vsyncpa [#allocation4], 0  ;;  %s264_s12 = smov [#allocation2]   ;;  %s192_s16 = scalar_lea.hbm %s337_s0, 256 }
   0x3   :  { %s16_s13 = sshll.u32 %s264_s12, 4  ;;  %p193_p0 = scmp.ne.s32.totalorder %s337_s0, %s192_s16  ;;  %s17_s13 = int_to_ptr.vmem [resolvable:$true] %s16_s13 }
   0x4   :  { %p196_p1 = scmp.lt.u32.totalorder %s192_s16, %s337_s0 }
   0x6   :  { %p198_p2 = pnand %p196_p1, %p193_p0 }
   0x8   :  { %201 = shalt.err (!%p198_p2)
}
   0x9   :  { %s202_s21 = scalar_lea.vmem %s17_s13, 256  ;;  %p207_p4 = scmp.lt.s32.totalorder %s17_s13, %s17_s13 }
   0xa   :  { %p203_p3 = scmp.ne.s32.totalorder %s17_s13, %s202_s21  ;;  %p208_p5 = scmp.lt.s32.totalorder %s202_s21, %s202_s21 }
   0xc   :  { %p209_p6 = por %p208_p5, %p207_p4 }
   0xe   :  { %p210_p7 = pnand %p209_p6, %p203_p3 }
  0x10   :  { %213 = shalt.err (!%p210_p7)
}
  0x11   :  { %s265_s22 = smov 128   ;;  %s266_s23 = smov 8  }
  0x12   :  { %22 = dma.hbm_to_vmem [thread:$0]  %s337_s0, 256, %s17_s13, [#allocation3], %s265_s22, %s265_s22, %s266_s23  }
  0x13   :  { %s267_s26 = smov [#allocation5]   ;;  %s214_s30 = scalar_lea.hbm %s338_s1, 512 }
  0x14   :  { %s28_s27 = sshll.u32 %s267_s26, 4  ;;  %p215_p8 = scmp.ne.s32.totalorder %s338_s1, %s214_s30  ;;  %s29_s27 = int_to_ptr.vmem [resolvable:$true] %s28_s27 }
  0x15   :  { %p218_p9 = scmp.lt.u32.totalorder %s214_s30, %s338_s1 }
  0x17   :  { %p220_p10 = pnand %p218_p9, %p215_p8 }
  0x19   :  { %223 = shalt.err (!%p220_p10)
}
  0x1a   :  { %s224_s8 = scalar_lea.vmem %s29_s27, 512  ;;  %p229_p12 = scmp.lt.s32.totalorder %s29_s27, %s29_s27 }
  0x1b   :  { %p225_p11 = scmp.ne.s32.totalorder %s29_s27, %s224_s8  ;;  %p230_p13 = scmp.lt.s32.totalorder %s224_s8, %s224_s8 }
  0x1d   :  { %p231_p0 = por %p230_p13, %p229_p12 }
  0x1f   :  { %p232_p1 = pnand %p231_p0, %p225_p11 }
  0x21   :  { %235 = shalt.err (!%p232_p1)
}
  0x22   :  { %34 = dma.hbm_to_vmem [thread:$0]  %s338_s1, 512, %s29_s27, [#allocation6], %s265_s22, %s265_s22, %s266_s23  }
  0x23   :  { %258 = dma.done.wait [#allocation3], 256  }
  0x24   :  { %259 = vsyncadd [#allocation3], 4294967040 }
  0x25   :  { %260 = dma.done.wait [#allocation6], 512  }
  0x26   :  { %261 = vsyncadd [#allocation6], 4294966784  ;;  %vm56_vm0 = vcmask 261120   ;;  %v45_v0 = vld [vmem:[#allocation5] sm:$0xff]  ;;  %v46_v1 = vld [vmem:[#allocation5 + $0x8] sm:$0xff]  ;;  %s268_s11 = smov [#allocation7]  }
  0x27   :  { %v47_v2 = vld [vmem:[#allocation5 + $0x10] sm:$0xff]  ;;  %v179_v3 = vpack.c.bf16 %v46_v1, %v45_v0  ;;  %v48_v4 = vld [vmem:[#allocation5 + $0x18] sm:$0xff]  ;;  %s146_s12 = sshll.u32 %s268_s11, 4  ;;  %vm138_vm1 = vcmask 785408   ;;  %s147_s12 = int_to_ptr.vmem [resolvable:$true] %s146_s12 }
  0x28   :  { %v43_v5 = vld [vmem:[#allocation2] sm:$0xff]  ;;  %v183_v6 = vpack.c.bf16 %v48_v4, %v47_v2  ;;  %v44_v7 = vld [vmem:[#allocation2 + $0x8] sm:$0xff]  ;;  %s236_s13 = scalar_lea.vmem %s147_s12, 256  ;;  %p241_p3 = scmp.lt.s32.totalorder %s147_s12, %s147_s12 }
  0x29   :  { %176 = vmatprep.mubr.msk.f32.mxu0 %vm56_vm0, %v43_v5  ;;  %180 = vmatprep.subr.bf16.mxu0 %v179_v3  ;;  %v159_v8 = vld [vmem:[%s339_s2] ss:$0 sm:$0xff]  ;;  %p237_p2 = scmp.ne.s32.totalorder %s147_s12, %s236_s13  ;;  %p242_p4 = scmp.lt.s32.totalorder %s236_s13, %s236_s13 }
  0x2a   :  { %182 = vmatpush3.bf16.msra.mxu0 %v179_v3 }
  0x2b   :  { %184 = vmatprep.subr.bf16.mxu0 %v183_v6  ;;  %p243_p5 = por %p242_p4, %p241_p3 }
  0x2d   :  { %p244_p6 = pnand %p243_p5, %p237_p2 }
  0x2e   :  { %186 = vmatpush3.bf16.msra.mxu0 %v183_v6 }
  0x31   :  { %177 = vmatmul.mubr.msk.f32.vlgmr.msra.gmra.mrb[0].mxu0 %vm56_vm0, %v44_v7 }
 0x104   :  { %v178_v9 = vpop.f32.mrb[0].mxu0 }
 0x105   :  { %v135_v10 = vadd.f32 %v178_v9, %v159_v8  ;;  %v129_v11 = vpop.f32.mrb[1].mxu0 }
 0x106   :  { %v130_v12 = vadd.f32 %v159_v8, %v129_v11 }
 0x107   :  { %140 = vst.msk [vmem:[#allocation7 + $0x8] sm:$0xff] %vm138_vm1, %v135_v10 }
 0x108   :  { %139 = vst.msk [vmem:[#allocation7] sm:$0xff] %vm138_vm1, %v130_v12 }
 0x109   :  { %247 = shalt.err (!%p244_p6)
}
 0x10a   :  { %s248_s2 = scalar_lea.hbm %s340_s3, 256 }
 0x10b   :  { %p249_p7 = scmp.ne.s32.totalorder %s340_s3, %s248_s2  ;;  %p252_p8 = scmp.lt.u32.totalorder %s248_s2, %s340_s3 }
 0x10d   :  { %p254_p9 = pnand %p252_p8, %p249_p7 }
 0x10f   :  { %257 = shalt.err (!%p254_p9)
}
 0x110   :  { %152 = dma.vmem_to_hbm [thread:$0]  %s147_s12, 256, %s340_s3, [#allocation4], %s265_s22, %s265_s22, %s266_s23  }
 0x111   :  { %262 = dma.done.wait [#allocation4], 256  }
 0x112   :  { %263 = vsyncadd [#allocation4], 4294967040 }
 0x113   :  { %156 = vsyncpa [#allocation3], 1 }
 0x114   :  { %157 = vsyncpa [#allocation6], 1 }
 0x115   :  { %158 = vsyncpa [#allocation4], 1 }

</bundles_post_ra>
